<compile_context>
chip_gen: v7x
topology: tpu7x:2x2x1
jax: 0.10.0
libtpu: 0.0.40
codegen_flags: <defaults>
</compile_context>

<pallas_src>
import functools

import jax
import jax.numpy as jnp
from jax.experimental import pallas as pl
from jax.experimental.pallas import tpu as pltpu

EPS = 1e-5
LANE = 128
SUBLANE = 8


def _cdiv(a, b):
    return -(-a // b)


def _round_up(a, b):
    return _cdiv(a, b) * b


def _round_down(a, b):
    return (a // b) * b


def _default_vmem_limit_bytes():
    """Generation-aware VMEM budget: physical capacity minus headroom."""
    try:
        cap = pltpu.get_tpu_info().vmem_capacity_bytes
    except Exception:
        cap = 64 * 1024 * 1024  # conservative portable fallback (v7x per-core)
    return max(32 * 1024 * 1024, cap - 24 * 1024 * 1024)


def adaln_kernel(x_ref, z_ref, w_ref, b_ref, o_ref, *, f):
    # Fused conditioning projection: one MXU matmul producing [gamma | beta].
    # Operands stay in their native dtype; accumulate in f32.
    gb = jnp.dot(z_ref[...], w_ref[...], preferred_element_type=jnp.float32)
    gb = gb + b_ref[...]                      # (1, 2F) fused-bias broadcast
    g = gb[:, :f]
    b = gb[:, f:]

    # LayerNorm statistics in f32 over the true (un-padded) feature width --
    # no lane mask needed since there are no padded lanes.
    x = x_ref[...].astype(jnp.float32)
    inv_f = jnp.float32(1.0 / f)
    mean = jnp.sum(x, axis=-1, keepdims=True) * inv_f
    xc = x - mean
    var = jnp.sum(xc * xc, axis=-1, keepdims=True) * inv_f
    std = jnp.sqrt(var)
    # Exact reciprocal keeps parity with the reference divide (approx=True
    # drifts past the 1e-5 tolerance).
    x_norm = xc * pl.reciprocal(std + EPS, approx=False)

    o_ref[...] = (g * x_norm + b).astype(o_ref.dtype)


def make_adaln_params(wg, bg, wb, bb, gamma, beta):
    """Fuse the two nn.Linear projections ONCE, next to the parameters.

    wg/wb: (F, C) in PyTorch nn.Linear layout.  Returns:
      w_fused: (C, 2F) = [Wg^T | Wb^T]
      b_fused: (1, 2F) = [bg + gamma | bb + beta]   (f32)
    """
    w_fused = jnp.concatenate([wg.T, wb.T], axis=1)
    b_fused = jnp.concatenate([
        bg.astype(jnp.float32) + gamma.astype(jnp.float32),
        bb.astype(jnp.float32) + beta.astype(jnp.float32),
    ])[None, :]
    return w_fused, b_fused


def adaln(x, z, w_fused, b_fused, *, row_tile=1024, vmem_limit_bytes=None):
    """x: (N, F), z: (N, C), pre-fused params from make_adaln_params. -> (N, F)."""
    N, F = x.shape
    Nz, C = z.shape
    assert Nz == N, "x and z must have the same number of rows"
    assert w_fused.shape == (C, 2 * F)
    assert b_fused.shape == (1, 2 * F)

    if vmem_limit_bytes is None:
        vmem_limit_bytes = _default_vmem_limit_bytes()
    vmem_limit_bytes = int(vmem_limit_bytes)

    # ---- Row-tile selection: largest SUBLANE multiple that fits the budget ----
    itemx = jnp.dtype(x.dtype).itemsize
    itemz = jnp.dtype(z.dtype).itemsize
    w_bytes = (w_fused.size * jnp.dtype(w_fused.dtype).itemsize
               + b_fused.size * jnp.dtype(b_fused.dtype).itemsize)  # single-buffered
    per_row_bytes = (2 * F * itemx       # x   (double-buffered)
                     + 2 * C * itemz     # z   (double-buffered)
                     + 2 * F * itemx     # out (double-buffered)
                     + 16 * F)           # live f32 temporaries (gb ~2F + centered x ~2F)
    budget = vmem_limit_bytes - w_bytes - (2 << 20)     # small pipeline slack
    rt_fit = max(SUBLANE, _round_down(max(budget, 0) // per_row_bytes, SUBLANE))
    row_tile = max(SUBLANE, min(_round_up(row_tile, SUBLANE), rt_fit,
                                _round_up(N, SUBLANE)))
    # Keep >= 2 grid steps when N allows so the "parallel" axis can shard
    # across both TensorCores on multi-core parts (v7x).
    if N >= 2 * SUBLANE and _cdiv(N, row_tile) < 2:
        row_tile = _round_up(_cdiv(N, 2), SUBLANE)

    grid = (_cdiv(N, row_tile),)

    kernel = functools.partial(adaln_kernel, f=F)
    full = lambda i: (0, 0)
    # Grid-invariant operands: single-buffered (block index never changes).
    invariant = dict(pipeline_mode=pl.Buffered(buffer_count=1))

    return pl.pallas_call(
        kernel,
        out_shape=jax.ShapeDtypeStruct((N, F), x.dtype),
        grid_spec=pltpu.PrefetchScalarGridSpec(
            num_scalar_prefetch=0,
            grid=grid,
            in_specs=[
                pl.BlockSpec((row_tile, F), lambda i: (i, 0)),      # x rows
                pl.BlockSpec((row_tile, C), lambda i: (i, 0)),      # z rows
                pl.BlockSpec((C, 2 * F), full, **invariant),        # [Wg^T | Wb^T]
                pl.BlockSpec((1, 2 * F), full, **invariant),        # fused bias
            ],
            out_specs=pl.BlockSpec((row_tile, F), lambda i: (i, 0)),
        ),
        compiler_params=pltpu.CompilerParams(
            dimension_semantics=("parallel",),
            vmem_limit_bytes=vmem_limit_bytes,
        ),
    )(x, z, w_fused, b_fused)


def adaln_ref(x, z, wg, bg, wb, bb, gamma, beta):
    """Pure-JAX reference matching the PyTorch forward."""
    g = z @ wg.T + bg + gamma
    b = z @ wb.T + bb + beta
    mean = jnp.mean(x, axis=-1, keepdims=True)
    std = jnp.sqrt(jnp.mean((x - mean) ** 2, axis=-1, keepdims=True))
    x_norm = (x - mean) / (std + EPS)
    return g * x_norm + b


if __name__ == "__main__":
    def run_case(key, B, S, F, C):
        kx, kz, kwg, kbg, kwb, kbb = jax.random.split(key, 6)
        x = jax.random.normal(kx, (B, S, F), dtype=jnp.float32)
        z = jax.random.normal(kz, (B, S, C), dtype=jnp.float32)

        # Deterministic synthetic parameters (Linear weights/biases + AdaLN params).
        wg = 0.1 * jax.random.normal(kwg, (F, C), dtype=jnp.float32)
        bg = 0.1 * jax.random.normal(kbg, (F,), dtype=jnp.float32)
        wb = 0.1 * jax.random.normal(kwb, (F, C), dtype=jnp.float32)
        bb = 0.1 * jax.random.normal(kbb, (F,), dtype=jnp.float32)
        gamma = jnp.ones((F,), dtype=jnp.float32)
        beta = jnp.zeros((F,), dtype=jnp.float32)

        N = B * S
        x2 = x.reshape(N, F)
        z2 = z.reshape(N, C)

        # Parameter fusion is hoisted out of the per-call path.
        w_fused, b_fused = make_adaln_params(wg, bg, wb, bb, gamma, beta)

        out = adaln(x2, z2, w_fused, b_fused).reshape(B, S, F)
        out = jax.block_until_ready(out)

        ref = adaln_ref(x2, z2, wg, bg, wb, bb, gamma, beta).reshape(B, S, F)
        assert jnp.allclose(out, ref, atol=1e-5, rtol=1e-5), "mismatch vs reference"

    key = jax.random.PRNGKey(0)
    k1, k2 = jax.random.split(key)
    # Small demo shapes: batch=2, seq=8, num_features=32, num_conds=16.
    run_case(k1, B=2, S=8, F=32, C=16)
    # Ragged row count (N=5) exercises the masked partial-last-tile path.
    run_case(k2, B=1, S=5, F=32, C=16)

    print("KERNEL_OK")
</pallas_src>

<mosaic_0001>
module attributes {stable_mosaic.version = 11 : i64} {
  func.func @adaln_kernel(%arg0: i32, %arg1: memref<8x32xf32, #tpu.memory_space<vmem>>, %arg2: memref<8x16xf32, #tpu.memory_space<vmem>>, %arg3: memref<16x64xf32, #tpu.memory_space<vmem>>, %arg4: memref<1x64xf32, #tpu.memory_space<vmem>>, %arg5: memref<8x32xf32, #tpu.memory_space<vmem>>) attributes {dimension_semantics = [#tpu.dimension_semantics<parallel>], iteration_bounds = array<i64: 2>, scalar_prefetch = 0 : i64, scratch_operands = 0 : i64, tpu.core_type = #tpu.core_type<tc>, window_params = [{transform_indices = @transform_0, window_bounds = array<i64: 8, 32>}, {transform_indices = @transform_1, window_bounds = array<i64: 8, 16>}, {pipeline_mode = #tpu.pipeline_mode<synchronous>, transform_indices = @transform_2, window_bounds = array<i64: 16, 64>}, {pipeline_mode = #tpu.pipeline_mode<synchronous>, transform_indices = @transform_3, window_bounds = array<i64: 1, 64>}, {transform_indices = @transform_4, window_bounds = array<i64: 8, 32>}]} {
    %c0 = arith.constant 0 : index
    %c0_0 = arith.constant 0 : index
    %0 = vector.load %arg2[%c0, %c0_0] : memref<8x16xf32, #tpu.memory_space<vmem>>, vector<8x16xf32>
    %c0_1 = arith.constant 0 : index
    %c0_2 = arith.constant 0 : index
    %1 = vector.load %arg3[%c0_1, %c0_2] : memref<16x64xf32, #tpu.memory_space<vmem>>, vector<16x64xf32>
    %cst = arith.constant dense<0.000000e+00> : vector<8x64xf32>
    %2 = tpu.matmul %0, %1, %cst {dimension_numbers = #tpu.dot_dimension_numbers<[1], [0], [0], [1], [0, 0, 1, 1], [], []>} : vector<8x16xf32>, vector<16x64xf32>, vector<8x64xf32> -> vector<8x64xf32>
    %c0_3 = arith.constant 0 : index
    %c0_4 = arith.constant 0 : index
    %3 = vector.load %arg4[%c0_3, %c0_4] : memref<1x64xf32, #tpu.memory_space<vmem>>, vector<1x64xf32>
    %4 = vector.broadcast %3 : vector<1x64xf32> to vector<8x64xf32>
    %5 = arith.addf %2, %4 : vector<8x64xf32>
    %6 = vector.extract_strided_slice %5 {offsets = [0, 0], sizes = [8, 32], strides = [1, 1]} : vector<8x64xf32> to vector<8x32xf32>
    %7 = vector.extract_strided_slice %5 {offsets = [0, 32], sizes = [8, 32], strides = [1, 1]} : vector<8x64xf32> to vector<8x32xf32>
    %c0_5 = arith.constant 0 : index
    %c0_6 = arith.constant 0 : index
    %8 = vector.load %arg1[%c0_5, %c0_6] : memref<8x32xf32, #tpu.memory_space<vmem>>, vector<8x32xf32>
    %cst_7 = arith.constant dense<0.000000e+00> : vector<8xf32>
    %9 = vector.multi_reduction <add>, %8, %cst_7 [1] : vector<8x32xf32> to vector<8xf32>
    %10 = vector.shape_cast %9 : vector<8xf32> to vector<8x1xf32>
    %cst_8 = arith.constant 3.125000e-02 : f32
    %11 = vector.broadcast %cst_8 : f32 to vector<8x1xf32>
    %12 = arith.mulf %10, %11 : vector<8x1xf32>
    %13 = vector.broadcast %12 : vector<8x1xf32> to vector<8x32xf32>
    %14 = arith.subf %8, %13 : vector<8x32xf32>
    %15 = arith.mulf %14, %14 : vector<8x32xf32>
    %cst_9 = arith.constant dense<0.000000e+00> : vector<8xf32>
    %16 = vector.multi_reduction <add>, %15, %cst_9 [1] : vector<8x32xf32> to vector<8xf32>
    %17 = vector.shape_cast %16 : vector<8xf32> to vector<8x1xf32>
    %cst_10 = arith.constant 3.125000e-02 : f32
    %18 = vector.broadcast %cst_10 : f32 to vector<8x1xf32>
    %19 = arith.mulf %17, %18 : vector<8x1xf32>
    %20 = math.sqrt %19 : vector<8x1xf32>
    %cst_11 = arith.constant 9.99999974E-6 : f32
    %21 = vector.broadcast %cst_11 : f32 to vector<8x1xf32>
    %22 = arith.addf %20, %21 : vector<8x1xf32>
    %23 = tpu.reciprocal %22 : vector<8x1xf32> -> vector<8x1xf32>
    %24 = vector.broadcast %23 : vector<8x1xf32> to vector<8x32xf32>
    %25 = arith.mulf %14, %24 : vector<8x32xf32>
    %26 = arith.mulf %6, %25 : vector<8x32xf32>
    %27 = arith.addf %26, %7 : vector<8x32xf32>
    %c0_12 = arith.constant 0 : index
    %c0_13 = arith.constant 0 : index
    %28 = vector.load %arg5[%c0_12, %c0_13] : memref<8x32xf32, #tpu.memory_space<vmem>>, vector<8x32xf32>
    tpu.vector_store %arg5[%c0_12, %c0_13], %27 {strides = array<i32>} : memref<8x32xf32, #tpu.memory_space<vmem>>, vector<8x32xf32>,
    return
  }
  func.func @transform_0(%arg0: i32) -> (i32, i32) {
    %c0_i32 = arith.constant 0 : i32
    %c0_i32_0 = arith.constant 0 : i32
    return %arg0, %c0_i32 : i32, i32
  }
  func.func @transform_1(%arg0: i32) -> (i32, i32) {
    %c0_i32 = arith.constant 0 : i32
    %c0_i32_0 = arith.constant 0 : i32
    return %arg0, %c0_i32 : i32, i32
  }
  func.func @transform_2(%arg0: i32) -> (i32, i32) {
    %c0_i32 = arith.constant 0 : i32
    %c0_i32_0 = arith.constant 0 : i32
    %c0_i32_1 = arith.constant 0 : i32
    return %c0_i32, %c0_i32_0 : i32, i32
  }
  func.func @transform_3(%arg0: i32) -> (i32, i32) {
    %c0_i32 = arith.constant 0 : i32
    %c0_i32_0 = arith.constant 0 : i32
    %c0_i32_1 = arith.constant 0 : i32
    return %c0_i32, %c0_i32_0 : i32, i32
  }
  func.func @transform_4(%arg0: i32) -> (i32, i32) {
    %c0_i32 = arith.constant 0 : i32
    %c0_i32_0 = arith.constant 0 : i32
    return %arg0, %c0_i32 : i32, i32
  }
}

</mosaic_0001>

<bundles_post_ra>
// kernel: tpu_custom_call.1
= control target key start
LH: loop header
LB: loop body
LE: loop exit
PB: predicated region body
PF: predicated region fallthrough
CT: control target
= control target key end

     0   :  { %s1037_s0 = inlined_call_operand.hbm [shape: f32[16,32], index: 0, kind: input, shape index: {}]   ;;  %s1038_s1 = inlined_call_operand.hbm [shape: f32[16,16], index: 1, kind: input, shape index: {}]   ;;  %s1039_s2 = inlined_call_operand.hbm [shape: f32[16,64], index: 2, kind: input, shape index: {}]   ;;  %s1040_s3 = inlined_call_operand.vmem [shape: f32[1,64], index: 3, kind: input, shape index: {}]   ;;  %s1041_s4 = inlined_call_operand.hbm [shape: f32[16,32], index: 4, kind: output, shape index: {}]  }
   0x1   :  { %1046 = sst [smem:[#allocation13_spill]] %s1039_s2 }
   0x2   :  { %9 = vsyncpa [#allocation3], 0 }
   0x3   :  { %11 = vsyncpa [#allocation3 + $0x1], 0 }
   0x4   :  { %12 = vsyncpa [#allocation6], 0 }
   0x5   :  { %14 = vsyncpa [#allocation6 + $0x1], 0 }
   0x6   :  { %15 = vsyncpa [#allocation4], 0 }
   0x7   :  { %17 = vsyncpa [#allocation4 + $0x1], 0  ;;  %s796_s15 = smov 0   ;;  %s798_s16 = smov 0  }
   0x8   :  { %s800_s17 = smov 0   ;;  %s802_s18 = smov 0  }
   0x9 LB: > { %s817_s19 = sadd.s32 4294967295, %s759_s18   ;;  %s493_s20 = sadd.s32 4294967294, %s759_s18   ;;  %s759_s18 = sphi %s802_s18, %s1065_s18   ;;  %s755_s17 = sphi %s800_s17, %s1064_s17   ;;  %s751_s16 = sphi %s798_s16, %s1063_s16   ;;  %s747_s15 = sphi %s796_s15, %s1062_s15  }
   0xa   : > { %p43_p0 = scmp.ne.s32.totalorder %s751_s16, %s747_s15  ;;  %p1042_p1 = scmp.eq.s32.totalorder %s817_s19, 0 }
   0xb   : > { %p141_p3 = scmp.eq.s32.totalorder %s493_s20, 1  ;;  %p494_p5 = scmp.ge.s32.totalorder %s759_s18, 1 }
   0xc   : > { %p826_p4 = por %p1042_p1, %p43_p0  ;;  %p148_p7 = scmp.lt.s32.totalorder %s759_s18, 3 }
   0xd   : > { %p831_p6 = por %p141_p3, %p43_p0  ;;  %s761_s24 = smov [#allocation7]  }
   0xe   : > { %s1047_s21 = scalar_select %p826_p4, 1, 0 }
   0xf   : > { %s1048_s22 = scalar_select %p831_p6, 1, 0 }
  0x10   : > { %p836_p8 = pnand %p494_p5, %p148_p7  ;;  %s160_s25 = sshll.u32 %s761_s24, 4  ;;  %s840_s25 = int_to_ptr.vmem [resolvable:$true] %s160_s25 }
  0x11   : > { %s852_s27 = sadd.s32 1, %s759_s18   ;;  %s30_s28 = sadd.s32 1, %s755_s17 }
  0x12   : > { %s1049_s23 = scalar_select %p836_p8, 1, 0 }
  0x13   : > { %p535_p9 = pneg %p836_p8  ;;  %s27_s29 = ssub.s32 %s759_s18, %s852_s27 }
  0x14   : > { %s1051_s2 = sld [smem:[#allocation13_spill]] }
  0x15   : > { %p847_p11 = pnand %p535_p9, %p1042_p1 }
  0x17   : > { %p599_p13 = pneg %p847_p11 }
  0x1a   : > { %s597_s6 = scalar_lea.hbm %s1051_s2, 256 }
  0x1b   : > { %p598_p12 = scmp.ne.s32.totalorder %s1051_s2, %s597_s6  ;;  %p604_p5 = scmp.lt.u32.totalorder %s597_s6, %s1051_s2 }
  0x1d   : > { %p600_p0 = pnand %p599_p13, %p598_p12 }
  0x1f   : > { %p601_p3 = pneg %p600_p0 }
  0x21   : > { %p606_p7 = pnand %p604_p5, %p601_p3 }
  0x23   : > { %609 = shalt.err (!%p606_p7)
}
  0x24   : > { %s610_s11 = scalar_lea.vmem %s840_s25, 256  ;;  %p618_p2 = scmp.lt.s32.totalorder %s840_s25, %s840_s25 }
  0x25   : > { %p611_p9 = scmp.ne.s32.totalorder %s840_s25, %s610_s11  ;;  %p619_p6 = scmp.lt.s32.totalorder %s610_s11, %s610_s11 }
  0x27   : > { %p613_p10 = pnand %p611_p9, %p599_p13  ;;  %p620_p4 = por %p619_p6, %p618_p2 }
  0x29   : > { %p614_p1 = pneg %p613_p10 }
  0x2b   : > { %p621_p8 = pnand %p620_p4, %p614_p1 }
  0x2d   : > { %624 = shalt.err (!%p621_p8)
}
  0x2e   : > { %s762_s12 = smov 128   ;;  %s763_s13 = smov 8  }
  0x2f   : > { %538 = dma.hbm_to_vmem [thread:$0]  (!%p847_p11), %s1051_s2, 256, %s840_s25, [#allocation6], %s762_s12, %s762_s12, %s763_s13  }
  0x30   : > { %p28_p2 = scmp.eq.s32.totalorder %s27_s29, 0  ;;  %p37_p1 = scmp.ne.s32.totalorder %s755_s17, %s751_s16 }
  0x31   : > { %p38_p4 = scmp.eq.s32.totalorder %s759_s18, 0  ;;  %p551_p6 = scmp.lt.s32.totalorder %s759_s18, 2 }
  0x32   : > { %s883_s24 = scalar_select %p28_p2, %s755_s17, %s30_s28  }
  0x33   : > { %p39_p8 = por %p38_p4, %p37_p1  ;;  %p1052_p10 = scmp.eq.s32.totalorder %s817_s19, 1 }
  0x34   : > { %s177_s5 = sand.u32 1, %s755_s17   ;;  %s498_s6 = sshll.u32 %s759_s18, 7 }
  0x35   : > { %p887_p12 = por %p1052_p10, %p37_p1  ;;  %s893_s7 = sshll.u32 %s177_s5, 3 }
  0x36   : > { %s898_s25 = scalar_lea.hbm %s1037_s0, %s498_s6  ;;  %s181_s28 = scalar_lea.vmem [#allocation2], %s893_s7 }
  0x37   : > { %s1053_s30 = scalar_select %p887_p12, 1, 0 }
  0x38   : > { %s188_s29 = sshll.u32 %s181_s28, 4  ;;  %p901_p11 = pnand %p551_p6, %p39_p8  ;;  %s905_s29 = int_to_ptr.vmem [resolvable:$true] %s188_s29 }
  0x39   : > { %s910_s12 = scalar_lea.hbm %s1038_s1, %s498_s6  ;;  %s178_s13 = scalar_lea.sflag [#allocation3], %s177_s5 }
  0x3a   : > { %s625_s14 = scalar_lea.hbm %s898_s25, 128  ;;  %p627_p0 = pneg %p901_p11 }
  0x3b   : > { %p626_p13 = scmp.ne.s32.totalorder %s898_s25, %s625_s14  ;;  %s630_s8 = scalar_lea.hbm %s1037_s0, 256 }
  0x3c   : > { %p631_p7 = scmp.lt.u32.totalorder %s898_s25, %s1037_s0  ;;  %p632_p9 = scmp.lt.u32.totalorder %s630_s8, %s625_s14 }
  0x3d   : > { %p628_p3 = pnand %p627_p0, %p626_p13  ;;  %p634_p1 = scmp.lt.u32.totalorder %s625_s14, %s898_s25 }
  0x3e   : > { %p633_p2 = por %p632_p9, %p631_p7 }
  0x3f   : > { %p629_p5 = pneg %p628_p3 }
  0x40   : > { %p635_p4 = por %p634_p1, %p633_p2 }
  0x42   : > { %p636_p6 = pnand %p635_p4, %p629_p5 }
  0x44   : > { %639 = shalt.err (!%p636_p6)
}
  0x45   : > { %s640_s5 = scalar_lea.vmem %s905_s29, 128  ;;  %s764_s6 = smov [#allocation2]  }
  0x46   : > { %p641_p8 = scmp.ne.s32.totalorder %s905_s29, %s640_s5  ;;  %s645_s10 = sshll.u32 %s764_s6, 4  ;;  %s646_s10 = int_to_ptr.vmem [resolvable:$false] %s645_s10 }
  0x47   : > { %s647_s2 = scalar_lea.vmem %s646_s10, 256  ;;  %p648_p3 = scmp.lt.s32.totalorder %s905_s29, %s646_s10 }
  0x48   : > { %p643_p10 = pnand %p641_p8, %p627_p0  ;;  %p649_p7 = scmp.lt.s32.totalorder %s647_s2, %s640_s5 }
  0x4a   : > { %p644_p13 = pneg %p643_p10  ;;  %p650_p9 = por %p649_p7, %p648_p3 }
  0x4c   : > { %p651_p2 = pnand %p650_p9, %p644_p13 }
  0x4e   : > { %654 = shalt.err (!%p651_p2)
}
  0x4f   : > { %542 = dma.hbm_to_vmem [thread:$0]  (!%p901_p11), %s898_s25, 128, %s905_s29, %s178_s13  }
  0x50   : > { %s195_s11 = sand.u32 1, %s759_s18   ;;  %s199_s14 = scalar_lea.vmem [#allocation5], %s893_s7 }
  0x51   : > { %s206_s20 = sshll.u32 %s199_s14, 4  ;;  %s196_s26 = scalar_lea.sflag [#allocation6], %s195_s11  ;;  %s207_s20 = int_to_ptr.vmem [resolvable:$true] %s206_s20 }
  0x52   : > { %s655_s8 = scalar_lea.hbm %s910_s12, 128  ;;  %s660_s6 = scalar_lea.hbm %s1038_s1, 256 }
  0x53   : > { %p656_p5 = scmp.ne.s32.totalorder %s910_s12, %s655_s8  ;;  %p661_p6 = scmp.lt.u32.totalorder %s910_s12, %s1038_s1 }
  0x54   : > { %p662_p8 = scmp.lt.u32.totalorder %s660_s6, %s655_s8  ;;  %p664_p13 = scmp.lt.u32.totalorder %s655_s8, %s910_s12 }
  0x55   : > { %p658_p1 = pnand %p656_p5, %p627_p0 }
  0x56   : > { %p663_p10 = por %p662_p8, %p661_p6 }
  0x57   : > { %p659_p4 = pneg %p658_p1 }
  0x58   : > { %p665_p3 = por %p664_p13, %p663_p10 }
  0x5a   : > { %p666_p7 = pnand %p665_p3, %p659_p4 }
  0x5c   : > { %669 = shalt.err (!%p666_p7)
}
  0x5d   : > { %s670_s7 = scalar_lea.vmem %s207_s20, 128  ;;  %s765_s25 = smov [#allocation5]  }
  0x5e   : > { %p671_p9 = scmp.ne.s32.totalorder %s207_s20, %s670_s7  ;;  %s675_s29 = sshll.u32 %s765_s25, 4  ;;  %s676_s29 = int_to_ptr.vmem [resolvable:$false] %s675_s29 }
  0x5f   : > { %s677_s13 = scalar_lea.vmem %s676_s29, 256  ;;  %p678_p1 = scmp.lt.s32.totalorder %s207_s20, %s676_s29 }
  0x60   : > { %p673_p2 = pnand %p671_p9, %p627_p0  ;;  %p679_p12 = scmp.lt.s32.totalorder %s677_s13, %s670_s7 }
  0x62   : > { %p674_p5 = pneg %p673_p2  ;;  %p680_p6 = por %p679_p12, %p678_p1 }
  0x64   : > { %p681_p8 = pnand %p680_p6, %p674_p5 }
  0x66   : > { %684 = shalt.err (!%p681_p8)
}
  0x67   : > { %545 = dma.hbm_to_vmem [thread:$0]  (!%p901_p11), %s910_s12, 128, %s207_s20, %s196_s26  }
  0x68   : > { %p1055_p4 = scmp.ne.s32.totalorder %s1049_s23, 0 }
  0x69   : > { %s961_s11 = sand.u32 (!%p1055_p4), 1, %s751_s16   ;;  %p1056_p12 = scmp.ne.s32.totalorder (!%p1055_p4), %s1047_s21, 0 }
  0x6a   : > { %215 = sbr.rel (%p1055_p4) target bundleno = 472 (0x1d8), region = 36  ;;  %s964_s14 = sshll.u32 (!%p1055_p4), %s961_s11, 3 }
  0x6b   : > { %s218_s8 = scalar_lea.sflag (!%p1055_p4), [#allocation3], %s961_s11  ;;  %s221_s28 = scalar_lea.vmem (!%p1055_p4), [#allocation2], %s964_s14 }
  0x71   : > { %730 = dma.done.wait (%p1056_p12), %s218_s8, 128  }
  0x72   : > { %732 = vsyncadd (%p1056_p12), %s218_s8, 4294967168  ;;  %s226_s23 = sand.u32 1, %s817_s19   ;;  %s230_s12 = scalar_lea.vmem [#allocation5], %s964_s14 }
  0x73   : > { %s227_s9 = scalar_lea.sflag [#allocation6], %s226_s23 }
  0x74   : > { %734 = dma.done.wait (%p1056_p12), %s227_s9, 128  }
  0x75   : > { %736 = vsyncadd (%p1056_p12), %s227_s9, 4294967168  ;;  %p1057_p11 = scmp.eq.s32.totalorder %s817_s19, 0 }
  0x77   : > { %738 = dma.done.wait (%p1057_p11), [#allocation6], 256   ;;  %p1058_p0 = pmov %p1057_p11 }
  0x78   : > { %v766_v0 = vmov 0.0|0.0   ;;  %vm767_vm0 = vmmov 0   ;;  %v768_v1 = vmov 0.0   ;;  %vm349_vm1 = vcmask 261120   ;;  %v348_v2 = vld [vmem:[%s221_s28] sm:$0xff]  ;;  %v264_v7 = vld [vmem:[%s230_s12] sm:$0xff] }
  0x79   : > { %740 = vsyncadd (%p1058_p0), [#allocation6], 4294967040  ;;  %522 = vmatprep.subr.bf16.mxu0 %v766_v0  ;;  %519 = vmatprep.mubr.msk.f32.mxu0 %vm767_vm0, %v768_v1  ;;  %v265_v3 = vld [vmem:[#allocation7] sm:$0xff]  ;;  %v266_v4 = vld [vmem:[#allocation7 + $0x8] sm:$0xff]  ;;  %v350_v5 = vsel %vm349_vm1, %v348_v2, 0.0  ;;  %vm274_vm2 = vcmask 130048  }
  0x7a   : > { %v523_v6 = vpack.c.bf16 %v266_v4, %v265_v3  ;;  %351 = vadd.xlane.f32.xlu0 %v350_v5  ;;  %v506_v13 = vld [vmem:[%s1040_s3] ss:$0 sm:$0xff]  ;;  %s769_s26 = smov 96   ;;  %s509_s5 = sshll.u32 %s817_s19, 7 }
  0x7b   : > { %s263_s6 = scalar_lea.vmem [#allocation8], %s964_s14  ;;  %s992_s25 = scalar_lea.hbm %s1041_s4, %s509_s5 }
  0x7c   : > { %524 = vmatpush3.bf16.msra.mxu0 %v523_v6  ;;  %s391_s10 = sshll.u32 %s263_s6, 4  ;;  %s378_s29 = scalar_lea.sflag [#allocation4], %s961_s11  ;;  %s994_s10 = int_to_ptr.vmem [resolvable:$true] %s391_s10 }
  0x7d   : > { %s685_s13 = scalar_lea.vmem %s994_s10, 128  ;;  %p1059_p13 = scmp.ne.s32.totalorder %s1053_s30, 0 }
  0x7e   : > { %p686_p10 = scmp.ne.s32.totalorder %s994_s10, %s685_s13  ;;  %s770_s19 = smov [#allocation8]  }
  0x7f   : > { %520 = vmatmul.mubr.msk.f32.vlgmr.msra.gmra.mrb[0].mxu0 %vm274_vm2, %v264_v7  ;;  %s689_s14 = sshll.u32 %s770_s19, 4  ;;  %s690_s14 = int_to_ptr.vmem [resolvable:$false] %s689_s14 }
  0x80   : > { %p687_p3 = pnand %p686_p10, %p1059_p13  ;;  %s691_s8 = scalar_lea.vmem %s690_s14, 256 }
  0x81   : > { %p692_p9 = scmp.lt.s32.totalorder %s994_s10, %s690_s14  ;;  %p693_p2 = scmp.lt.s32.totalorder %s691_s8, %s685_s13 }
  0x82   : > { %p688_p7 = pneg %p687_p3 }
  0x83   : > { %p694_p5 = por %p693_p2, %p692_p9 }
  0x85   : > { %p695_p1 = pnand %p694_p5, %p688_p7 }
 0x107   : > { %v352_v8 = vpop.xlane.xlu0 %351 }
 0x108   : > { %v353_v9 = vmul.f32 0.03125, %v352_v8 }
 0x10a   : > { %v354_v10 = vsub.f32 %v348_v2, %v353_v9 }
 0x10c   : > { %v355_v11 = vmul.f32 %v354_v10, %v354_v10 }
 0x10e   : > { %v356_v12 = vsel %vm349_vm1, %v355_v11, 0.0 }
 0x10f   : > { %357 = vadd.xlane.f32.xlu0 %v356_v12 }
 0x152   : > { %v344_v14 = vpop.f32.mrb[0].mxu0 }
 0x153   : > { %v345_v15 = vadd.f32 %v506_v13, %v344_v14  ;;  %v521_v16 = vpop.f32.mrb[1].mxu0 }
 0x155   : > { %372 = vrot.lane.b32.xlu1 %v345_v15, %s769_s26 }
 0x19c   : > { %v358_v17 = vpop.xlane.xlu0 %357 }
 0x19d   : > { %v359_v18 = vmul.f32 0.03125, %v358_v17 }
 0x19f   : > { %593 = vrsqrt.f32 %v359_v18  ;;  %vm362_vm3 = vcmp.eq.f32.partialorder %v359_v18, inf  ;;  %v365_v21 = vand.u32 2147483648, %v359_v18  ;;  %vm364_vm4 = vcmp.eq.f32.partialorder %v359_v18, 0.0 }
 0x1a9   : > { %v594_v19 = vpop.eup %593 }
 0x1aa   : > { %v361_v20 = vmul.f32 %v594_v19, %v359_v18 }
 0x1ac   : > { %v363_v22 = vsel %vm362_vm3, %v359_v18, %v361_v20 }
 0x1ad   : > { %v366_v23 = vsel %vm364_vm4, %v365_v21, %v363_v22 }
 0x1ae   : > { %v367_v24 = vadd.f32 1e-05, %v366_v23 }
 0x1b0   : > { %595 = vrcp.f32 %v367_v24 }
 0x1ba   : > { %v596_v25 = vpop.eup %595 }
 0x1bb   : > { %v369_v26 = vmul.f32 %v596_v25, %v354_v10 }
 0x1bd   : > { %v370_v27 = vmul.f32 %v369_v26, %v345_v15 }
 0x1c7   : > { %v373_v28 = vpop.permute.xlu1 %372 }
 0x1c8   : > { %v375_v29 = vadd.f32 %v373_v28, %v370_v27 }
 0x1ca   : > { %376 = vst.msk [vmem:[%s263_s6] sm:$0xff] %vm349_vm1, %v375_v29 }
 0x1cb   : > { %698 = shalt.err (!%p695_p1)
}
 0x1cc   : > { %s699_s11 = scalar_lea.hbm %s992_s25, 128  ;;  %s703_s9 = scalar_lea.hbm %s1041_s4, 256 }
 0x1cd   : > { %p700_p6 = scmp.ne.s32.totalorder %s992_s25, %s699_s11  ;;  %p704_p12 = scmp.lt.u32.totalorder %s992_s25, %s1041_s4 }
 0x1ce   : > { %p705_p11 = scmp.lt.u32.totalorder %s703_s9, %s699_s11  ;;  %p707_p10 = scmp.lt.u32.totalorder %s699_s11, %s992_s25 }
 0x1cf   : > { %p701_p8 = pnand %p700_p6, %p1059_p13 }
 0x1d0   : > { %p706_p0 = por %p705_p11, %p704_p12 }
 0x1d1   : > { %p702_p4 = pneg %p701_p8 }
 0x1d2   : > { %p708_p3 = por %p707_p10, %p706_p0 }
 0x1d4   : > { %p709_p7 = pnand %p708_p3, %p702_p4 }
 0x1d6   : > { %712 = shalt.err (!%p709_p7)
}
 0x1d7   : > { %533 = dma.vmem_to_hbm [thread:$0]  (%p1059_p13), %s994_s10, 128, %s992_s25, %s378_s29  }
 0x1d8 PF: > { %s403_s20 = sand.u32 1, %s747_s15   ;;  %p1060_p9 = scmp.ne.s32.totalorder %s1048_s22, 0 }
 0x1d9   : > { %p1061_p2 = scmp.ge.s32.totalorder %s759_s18, 2  ;;  %s404_s26 = scalar_lea.sflag [#allocation4], %s403_s20 }
 0x1db   : > { %p547_p5 = pnand %p1061_p2, %p1060_p9 }
 0x1dd   : > { %742 = dma.done.wait (!%p547_p5), %s404_s26, 128  }
 0x1de   : > { %744 = vsyncadd (!%p547_p5), %s404_s26, 4294967168  ;;  %p20_p1 = scmp.ge.s32.totalorder %s852_s27, 4   ;;  %s1062_s15 = smov %s751_s16 }
 0x1df   : > { %s1063_s16 = smov %s755_s17  ;;  %s1064_s17 = smov %s883_s24 }
 0x1e0   : > { %s1065_s18 = smov %s852_s27  ;;  %22 = sbr.rel (!%p20_p1) target bundleno = 9 (0x9), region = 98 }
 0x1e7   :  { %409 = vsyncpa [#allocation3], 1 }
 0x1e8   :  { %411 = vsyncpa [#allocation3 + $0x1], 1 }
 0x1e9   :  { %412 = vsyncpa [#allocation6], 1 }
 0x1ea   :  { %414 = vsyncpa [#allocation6 + $0x1], 1 }
 0x1eb   :  { %415 = vsyncpa [#allocation4], 1 }
 0x1ec   :  { %417 = vsyncpa [#allocation4 + $0x1], 1 }

</bundles_post_ra>
